<compile_context>
chip_gen: v7x
topology: tpu7x:2x2x1
jax: 0.10.0
libtpu: 0.0.40
codegen_flags: <defaults>
</compile_context>

<pallas_src>
import functools

import jax
import jax.numpy as jnp
from jax.experimental import pallas as pl
from jax.experimental.pallas import tpu as pltpu

LANE = 128          # vreg lane width
SUBLANE = 8         # vreg sublane count (f32)
MAX_TILE_B = 256    # batch tile (multiple of 8; activation footprint is tiny)


def _round_up(x, m):
    return ((x + m - 1) // m) * m


def actor_mlp_kernel(x_ref, w1_ref, b1_ref, w2_ref, b2_ref, w3_ref, b3_ref, o_ref,
                     *, n_actions):
    # Activations cast to bf16 for the MXU; accumulate in f32; elementwise in f32.
    x = x_ref[...].astype(jnp.bfloat16)

    # fc1 + ReLU
    h1 = jnp.dot(x, w1_ref[...], preferred_element_type=jnp.float32) + b1_ref[...]
    h1 = jnp.maximum(h1, 0.0)

    # fc2 + ReLU
    h2 = jnp.dot(h1.astype(jnp.bfloat16), w2_ref[...],
                 preferred_element_type=jnp.float32) + b2_ref[...]
    h2 = jnp.maximum(h2, 0.0)

    # fc3 (logits, padded out to 128 lanes)
    logits = jnp.dot(h2.astype(jnp.bfloat16), w3_ref[...],
                     preferred_element_type=jnp.float32) + b3_ref[...]

    # Mask padded action lanes so they do not contribute to the softmax.
    lane_ids = jax.lax.broadcasted_iota(jnp.int32, logits.shape, 1)
    logits = jnp.where(lane_ids < n_actions, logits, jnp.float32(-1e30))

    # Numerically stable softmax; reciprocal goes to the (otherwise idle) EUP slot.
    m = jnp.max(logits, axis=-1, keepdims=True)
    e = jnp.exp(logits - m)
    denom = jnp.sum(e, axis=-1, keepdims=True)
    probs = e * pl.reciprocal(denom, approx=True)

    o_ref[...] = probs.astype(o_ref.dtype)


def prepare_actor_params(w1, b1, w2, b2, w3, b3, param_dtype=jnp.bfloat16):
    """One-time prep: zero-pad every feature dim to 128 lanes, weights -> bf16."""
    def pad2(a, rows, cols):
        return jnp.pad(a, ((0, rows - a.shape[0]), (0, cols - a.shape[1])))

    in_p = _round_up(w1.shape[0], LANE)
    h1_p = _round_up(w1.shape[1], LANE)
    h2_p = _round_up(w2.shape[1], LANE)
    out_p = _round_up(w3.shape[1], LANE)

    w1p = pad2(w1, in_p, h1_p).astype(param_dtype)
    w2p = pad2(w2, h1_p, h2_p).astype(param_dtype)
    w3p = pad2(w3, h2_p, out_p).astype(param_dtype)
    # Biases stay f32: they add onto f32 accumulators (v5e VPU has no bf16).
    b1p = pad2(b1.reshape(1, -1), 1, h1_p).astype(jnp.float32)
    b2p = pad2(b2.reshape(1, -1), 1, h2_p).astype(jnp.float32)
    b3p = pad2(b3.reshape(1, -1), 1, out_p).astype(jnp.float32)
    return w1p, b1p, w2p, b2p, w3p, b3p


@functools.partial(jax.jit, static_argnames=("n_actions",))
def actor_forward(state, w1, b1, w2, b2, w3, b3, *, n_actions):
    """state: (B, input_dims) f32; padded/bf16 params from prepare_actor_params."""
    B, in_dims = state.shape
    in_p, h1_p = w1.shape
    h2_p = w2.shape[1]
    out_p = w3.shape[1]

    # Batch tile: as large as useful, multiple of 8 sublanes.
    tile_b = min(MAX_TILE_B, _round_up(B, SUBLANE))
    b_pad = _round_up(B, tile_b)
    grid = (pl.cdiv(b_pad, tile_b),)

    # Pad batch rows and feature lanes (zeros are harmless; sliced off below).
    x = jnp.pad(state.astype(jnp.float32), ((0, b_pad - B), (0, in_p - in_dims)))

    const = lambda i: (0, 0)  # weights/biases: same block every step -> VMEM-resident
    in_specs = [
        pl.BlockSpec((tile_b, in_p), lambda i: (i, 0)),   # state tile
        pl.BlockSpec((in_p, h1_p), const),
        pl.BlockSpec((1, h1_p), const),
        pl.BlockSpec((h1_p, h2_p), const),
        pl.BlockSpec((1, h2_p), const),
        pl.BlockSpec((h2_p, out_p), const),
        pl.BlockSpec((1, out_p), const),
    ]
    out_spec = pl.BlockSpec((tile_b, out_p), lambda i: (i, 0))  # lane-dense store

    flops = 2 * b_pad * (in_p * h1_p + h1_p * h2_p + h2_p * out_p)
    bytes_accessed = (
        b_pad * in_p * 4                                   # state in (f32)
        + (in_p * h1_p + h1_p * h2_p + h2_p * out_p) * 2   # bf16 weights
        + (h1_p + h2_p + out_p) * 4                        # f32 biases
        + b_pad * out_p * 4                                # output (f32)
    )
    cost = pl.CostEstimate(flops=flops,
                           transcendentals=b_pad * out_p,
                           bytes_accessed=bytes_accessed)

    out = pl.pallas_call(
        functools.partial(actor_mlp_kernel, n_actions=n_actions),
        out_shape=jax.ShapeDtypeStruct((b_pad, out_p), jnp.float32),
        grid_spec=pltpu.PrefetchScalarGridSpec(
            num_scalar_prefetch=0,
            grid=grid,
            in_specs=in_specs,
            out_specs=out_spec,
        ),
        compiler_params=pltpu.CompilerParams(
            dimension_semantics=("parallel",),      # shard batch axis across TCs (v7x)
            vmem_limit_bytes=32 * 1024 * 1024,      # explicit budget (v7x: 64 MiB phys)
        ),
        cost_estimate=cost,
    )(x, w1, b1, w2, b2, w3, b3)

    return out[:B, :n_actions]


def init_linear_params(key, fan_in, fan_out):
    # Mimic PyTorch nn.Linear default init: U(-1/sqrt(fan_in), 1/sqrt(fan_in)).
    kw, kb = jax.random.split(key)
    bound = 1.0 / jnp.sqrt(jnp.float32(fan_in))
    w = jax.random.uniform(kw, (fan_in, fan_out), jnp.float32, -bound, bound)
    b = jax.random.uniform(kb, (1, fan_out), jnp.float32, -bound, bound)
    return w, b


def _reference(state, w1, b1, w2, b2, w3, b3):
    h1 = jnp.maximum(state @ w1 + b1, 0.0)
    h2 = jnp.maximum(h1 @ w2 + b2, 0.0)
    return jax.nn.softmax(h2 @ w3 + b3, axis=-1)


if __name__ == "__main__":
    # Small shapes consistent with the module's MLP structure.
    batch = 8
    input_dims = 16
    fc1_dims = 32
    fc2_dims = 32
    n_actions = 8

    key = jax.random.PRNGKey(0)
    k_state, k_state2, k1, k2, k3 = jax.random.split(key, 5)

    state = jax.random.normal(k_state, (batch, input_dims), jnp.float32)
    w1, b1 = init_linear_params(k1, input_dims, fc1_dims)
    w2, b2 = init_linear_params(k2, fc1_dims, fc2_dims)
    w3, b3 = init_linear_params(k3, fc2_dims, n_actions)

    # One-time padding/casting of parameters (done outside the kernel).
    pw1, pb1, pw2, pb2, pw3, pb3 = prepare_actor_params(w1, b1, w2, b2, w3, b3)

    probs = actor_forward(state, pw1, pb1, pw2, pb2, pw3, pb3, n_actions=n_actions)
    jax.block_until_ready(probs)

    ref = _reference(state, w1, b1, w2, b2, w3, b3)
    assert probs.shape == (batch, n_actions)
    # bf16 weights + approx reciprocal -> looser tolerances than pure f32.
    assert jnp.allclose(probs, ref, atol=2e-2, rtol=2e-2)
    assert jnp.allclose(jnp.sum(probs, axis=-1), 1.0, atol=5e-3)

    # Exercise the multi-tile grid path (grid=(2,), padded/uneven batch).
    batch2 = 300
    state2 = jax.random.normal(k_state2, (batch2, input_dims), jnp.float32)
    probs2 = actor_forward(state2, pw1, pb1, pw2, pb2, pw3, pb3, n_actions=n_actions)
    jax.block_until_ready(probs2)
    ref2 = _reference(state2, w1, b1, w2, b2, w3, b3)
    assert probs2.shape == (batch2, n_actions)
    assert jnp.allclose(probs2, ref2, atol=2e-2, rtol=2e-2)
    assert jnp.allclose(jnp.sum(probs2, axis=-1), 1.0, atol=5e-3)

    # TODO(synk): torch.distributions.Categorical, the Adam optimizer and the
    # save/load_state_dict machinery have no Pallas equivalent; the kernel
    # returns the Categorical's `probs` tensor.
    print("KERNEL_OK")
</pallas_src>

<mosaic_0001>
module attributes {stable_mosaic.version = 11 : i64} {
  func.func @actor_mlp_kernel(%arg0: i32, %arg1: memref<8x128xf32, #tpu.memory_space<vmem>>, %arg2: memref<128x128xbf16, #tpu.memory_space<vmem>>, %arg3: memref<1x128xf32, #tpu.memory_space<vmem>>, %arg4: memref<128x128xbf16, #tpu.memory_space<vmem>>, %arg5: memref<1x128xf32, #tpu.memory_space<vmem>>, %arg6: memref<128x128xbf16, #tpu.memory_space<vmem>>, %arg7: memref<1x128xf32, #tpu.memory_space<vmem>>, %arg8: memref<8x128xf32, #tpu.memory_space<vmem>>) attributes {dimension_semantics = [#tpu.dimension_semantics<parallel>], iteration_bounds = array<i64: 1>, scalar_prefetch = 0 : i64, scratch_operands = 0 : i64, tpu.core_type = #tpu.core_type<tc>, window_params = [{transform_indices = @transform_0, window_bounds = array<i64: 8, 128>}, {pipeline_mode = #tpu.pipeline_mode<synchronous>, transform_indices = @transform_1, window_bounds = array<i64: 128, 128>}, {pipeline_mode = #tpu.pipeline_mode<synchronous>, transform_indices = @transform_2, window_bounds = array<i64: 1, 128>}, {pipeline_mode = #tpu.pipeline_mode<synchronous>, transform_indices = @transform_3, window_bounds = array<i64: 128, 128>}, {pipeline_mode = #tpu.pipeline_mode<synchronous>, transform_indices = @transform_4, window_bounds = array<i64: 1, 128>}, {pipeline_mode = #tpu.pipeline_mode<synchronous>, transform_indices = @transform_5, window_bounds = array<i64: 128, 128>}, {pipeline_mode = #tpu.pipeline_mode<synchronous>, transform_indices = @transform_6, window_bounds = array<i64: 1, 128>}, {transform_indices = @transform_7, window_bounds = array<i64: 8, 128>}]} {
    %c0 = arith.constant 0 : index
    %c0_0 = arith.constant 0 : index
    %0 = vector.load %arg1[%c0, %c0_0] : memref<8x128xf32, #tpu.memory_space<vmem>>, vector<8x128xf32>
    %1 = arith.truncf %0 : vector<8x128xf32> to vector<8x128xbf16>
    %c0_1 = arith.constant 0 : index
    %c0_2 = arith.constant 0 : index
    %2 = vector.load %arg2[%c0_1, %c0_2] : memref<128x128xbf16, #tpu.memory_space<vmem>>, vector<128x128xbf16>
    %cst = arith.constant dense<0.000000e+00> : vector<8x128xf32>
    %3 = tpu.matmul %1, %2, %cst {dimension_numbers = #tpu.dot_dimension_numbers<[1], [0], [0], [1], [0, 0, 1, 1], [], []>} : vector<8x128xbf16>, vector<128x128xbf16>, vector<8x128xf32> -> vector<8x128xf32>
    %c0_3 = arith.constant 0 : index
    %c0_4 = arith.constant 0 : index
    %4 = vector.load %arg3[%c0_3, %c0_4] : memref<1x128xf32, #tpu.memory_space<vmem>>, vector<1x128xf32>
    %5 = vector.broadcast %4 : vector<1x128xf32> to vector<8x128xf32>
    %6 = arith.addf %3, %5 : vector<8x128xf32>
    %cst_5 = arith.constant 0.000000e+00 : f32
    %7 = vector.broadcast %cst_5 : f32 to vector<8x128xf32>
    %8 = arith.maximumf %6, %7 : vector<8x128xf32>
    %9 = arith.truncf %8 : vector<8x128xf32> to vector<8x128xbf16>
    %c0_6 = arith.constant 0 : index
    %c0_7 = arith.constant 0 : index
    %10 = vector.load %arg4[%c0_6, %c0_7] : memref<128x128xbf16, #tpu.memory_space<vmem>>, vector<128x128xbf16>
    %cst_8 = arith.constant dense<0.000000e+00> : vector<8x128xf32>
    %11 = tpu.matmul %9, %10, %cst_8 {dimension_numbers = #tpu.dot_dimension_numbers<[1], [0], [0], [1], [0, 0, 1, 1], [], []>} : vector<8x128xbf16>, vector<128x128xbf16>, vector<8x128xf32> -> vector<8x128xf32>
    %c0_9 = arith.constant 0 : index
    %c0_10 = arith.constant 0 : index
    %12 = vector.load %arg5[%c0_9, %c0_10] : memref<1x128xf32, #tpu.memory_space<vmem>>, vector<1x128xf32>
    %13 = vector.broadcast %12 : vector<1x128xf32> to vector<8x128xf32>
    %14 = arith.addf %11, %13 : vector<8x128xf32>
    %cst_11 = arith.constant 0.000000e+00 : f32
    %15 = vector.broadcast %cst_11 : f32 to vector<8x128xf32>
    %16 = arith.maximumf %14, %15 : vector<8x128xf32>
    %17 = arith.truncf %16 : vector<8x128xf32> to vector<8x128xbf16>
    %c0_12 = arith.constant 0 : index
    %c0_13 = arith.constant 0 : index
    %18 = vector.load %arg6[%c0_12, %c0_13] : memref<128x128xbf16, #tpu.memory_space<vmem>>, vector<128x128xbf16>
    %cst_14 = arith.constant dense<0.000000e+00> : vector<8x128xf32>
    %19 = tpu.matmul %17, %18, %cst_14 {dimension_numbers = #tpu.dot_dimension_numbers<[1], [0], [0], [1], [0, 0, 1, 1], [], []>} : vector<8x128xbf16>, vector<128x128xbf16>, vector<8x128xf32> -> vector<8x128xf32>
    %c0_15 = arith.constant 0 : index
    %c0_16 = arith.constant 0 : index
    %20 = vector.load %arg7[%c0_15, %c0_16] : memref<1x128xf32, #tpu.memory_space<vmem>>, vector<1x128xf32>
    %21 = vector.broadcast %20 : vector<1x128xf32> to vector<8x128xf32>
    %22 = arith.addf %19, %21 : vector<8x128xf32>
    %23 = tpu.iota {dimensions = array<i32: 1>} : vector<8x128xi32>
    %c8_i32 = arith.constant 8 : i32
    %24 = vector.broadcast %c8_i32 : i32 to vector<8x128xi32>
    %25 = arith.cmpi slt, %23, %24 : vector<8x128xi32>
    %cst_17 = arith.constant -1.000000e+30 : f32
    %26 = vector.broadcast %cst_17 : f32 to vector<8x128xf32>
    %27 = arith.select %25, %22, %26 : vector<8x128xi1>, vector<8x128xf32>
    %cst_18 = arith.constant dense<0xFF800000> : vector<8xf32>
    %28 = vector.multi_reduction <maximumf>, %27, %cst_18 [1] : vector<8x128xf32> to vector<8xf32>
    %29 = vector.shape_cast %28 : vector<8xf32> to vector<8x1xf32>
    %30 = vector.broadcast %29 : vector<8x1xf32> to vector<8x128xf32>
    %31 = arith.subf %27, %30 : vector<8x128xf32>
    %32 = math.exp %31 : vector<8x128xf32>
    %cst_19 = arith.constant dense<0.000000e+00> : vector<8xf32>
    %33 = vector.multi_reduction <add>, %32, %cst_19 [1] : vector<8x128xf32> to vector<8xf32>
    %34 = vector.shape_cast %33 : vector<8xf32> to vector<8x1xf32>
    %35 = tpu.reciprocal %34 {approx = true} : vector<8x1xf32> -> vector<8x1xf32>
    %36 = vector.broadcast %35 : vector<8x1xf32> to vector<8x128xf32>
    %37 = arith.mulf %32, %36 : vector<8x128xf32>
    %c0_20 = arith.constant 0 : index
    %c0_21 = arith.constant 0 : index
    %38 = vector.load %arg8[%c0_20, %c0_21] : memref<8x128xf32, #tpu.memory_space<vmem>>, vector<8x128xf32>
    tpu.vector_store %arg8[%c0_20, %c0_21], %37 {strides = array<i32>} : memref<8x128xf32, #tpu.memory_space<vmem>>, vector<8x128xf32>,
    return
  }
  func.func @transform_0(%arg0: i32) -> (i32, i32) {
    %c0_i32 = arith.constant 0 : i32
    %c0_i32_0 = arith.constant 0 : i32
    return %arg0, %c0_i32 : i32, i32
  }
  func.func @transform_1(%arg0: i32) -> (i32, i32) {
    %c0_i32 = arith.constant 0 : i32
    %c0_i32_0 = arith.constant 0 : i32
    %c0_i32_1 = arith.constant 0 : i32
    return %c0_i32, %c0_i32_0 : i32, i32
  }
  func.func @transform_2(%arg0: i32) -> (i32, i32) {
    %c0_i32 = arith.constant 0 : i32
    %c0_i32_0 = arith.constant 0 : i32
    %c0_i32_1 = arith.constant 0 : i32
    return %c0_i32, %c0_i32_0 : i32, i32
  }
  func.func @transform_3(%arg0: i32) -> (i32, i32) {
    %c0_i32 = arith.constant 0 : i32
    %c0_i32_0 = arith.constant 0 : i32
    %c0_i32_1 = arith.constant 0 : i32
    return %c0_i32, %c0_i32_0 : i32, i32
  }
  func.func @transform_4(%arg0: i32) -> (i32, i32) {
    %c0_i32 = arith.constant 0 : i32
    %c0_i32_0 = arith.constant 0 : i32
    %c0_i32_1 = arith.constant 0 : i32
    return %c0_i32, %c0_i32_0 : i32, i32
  }
  func.func @transform_5(%arg0: i32) -> (i32, i32) {
    %c0_i32 = arith.constant 0 : i32
    %c0_i32_0 = arith.constant 0 : i32
    %c0_i32_1 = arith.constant 0 : i32
    return %c0_i32, %c0_i32_0 : i32, i32
  }
  func.func @transform_6(%arg0: i32) -> (i32, i32) {
    %c0_i32 = arith.constant 0 : i32
    %c0_i32_0 = arith.constant 0 : i32
    %c0_i32_1 = arith.constant 0 : i32
    return %c0_i32, %c0_i32_0 : i32, i32
  }
  func.func @transform_7(%arg0: i32) -> (i32, i32) {
    %c0_i32 = arith.constant 0 : i32
    %c0_i32_0 = arith.constant 0 : i32
    return %arg0, %c0_i32 : i32, i32
  }
}

</mosaic_0001>

<bundles_post_ra>
// kernel: actor_forward.1
= control target key start
LH: loop header
LB: loop body
LE: loop exit
PB: predicated region body
PF: predicated region fallthrough
CT: control target
= control target key end

     0   :  { %12 = vsyncpa [#allocation3], 0  ;;  %s836_s0 = inlined_call_operand.vmem [shape: f32[8,128], index: 0, kind: input, shape index: {}]   ;;  %s837_s1 = inlined_call_operand.hbm [shape: bf16[128,128], index: 1, kind: input, shape index: {}]   ;;  %s838_s2 = inlined_call_operand.vmem [shape: f32[1,128], index: 2, kind: input, shape index: {}]   ;;  %s839_s3 = inlined_call_operand.hbm [shape: bf16[128,128], index: 3, kind: input, shape index: {}]   ;;  %s840_s4 = inlined_call_operand.vmem [shape: f32[1,128], index: 4, kind: input, shape index: {}]   ;;  %s841_s5 = inlined_call_operand.hbm [shape: bf16[128,128], index: 5, kind: input, shape index: {}]   ;;  %s842_s6 = inlined_call_operand.vmem [shape: f32[1,128], index: 6, kind: input, shape index: {}]   ;;  %s843_s7 = inlined_call_operand.hbm [shape: f32[8,128], index: 7, kind: output, shape index: {}]  }
   0x1   :  { %13 = vsyncpa [#allocation6], 0 }
   0x2   :  { %14 = vsyncpa [#allocation4], 0  ;;  %s682_s24 = smov [#allocation5]   ;;  %s683_s26 = smov [#allocation2]  }
   0x3   :  { %s36_s25 = sshll.u32 %s682_s24, 4  ;;  %s22_s27 = sshll.u32 %s683_s26, 4  ;;  %s37_s25 = int_to_ptr.vmem [resolvable:$true] %s36_s25  ;;  %s730_s27 = int_to_ptr.vmem [resolvable:$true] %s22_s27 }
   0x4   :  { %s588_s30 = scalar_lea.hbm %s839_s3, 1024 }
   0x5   :  { %p589_p0 = scmp.ne.s32.totalorder %s839_s3, %s588_s30  ;;  %p592_p1 = scmp.lt.u32.totalorder %s588_s30, %s839_s3 }
   0x7   :  { %p594_p2 = pnand %p592_p1, %p589_p0 }
   0x9   :  { %597 = shalt.err (!%p594_p2)
}
   0xa   :  { %s598_s12 = scalar_lea.vmem %s37_s25, 1024  ;;  %p603_p4 = scmp.lt.s32.totalorder %s37_s25, %s37_s25 }
   0xb   :  { %p599_p3 = scmp.ne.s32.totalorder %s37_s25, %s598_s12  ;;  %p604_p5 = scmp.lt.s32.totalorder %s598_s12, %s598_s12 }
   0xd   :  { %p605_p6 = por %p604_p5, %p603_p4 }
   0xf   :  { %p606_p7 = pnand %p605_p6, %p599_p3 }
  0x11   :  { %609 = shalt.err (!%p606_p7)
}
  0x12   :  { %s684_s13 = smov 64   ;;  %s685_s14 = smov 4  }
  0x13   :  { %42 = dma.hbm_to_vmem [thread:$0]  %s839_s3, 1024, %s37_s25, [#allocation6], %s684_s13, %s684_s13, %s685_s14  }
  0x14   :  { %s610_s19 = scalar_lea.hbm %s837_s1, 1024 }
  0x15   :  { %p611_p8 = scmp.ne.s32.totalorder %s837_s1, %s610_s19  ;;  %p614_p9 = scmp.lt.u32.totalorder %s610_s19, %s837_s1 }
  0x17   :  { %p616_p10 = pnand %p614_p9, %p611_p8 }
  0x19   :  { %619 = shalt.err (!%p616_p10)
}
  0x1a   :  { %s620_s24 = scalar_lea.vmem %s730_s27, 1024  ;;  %p625_p12 = scmp.lt.s32.totalorder %s730_s27, %s730_s27 }
  0x1b   :  { %p621_p11 = scmp.ne.s32.totalorder %s730_s27, %s620_s24  ;;  %p626_p13 = scmp.lt.s32.totalorder %s620_s24, %s620_s24 }
  0x1d   :  { %p627_p0 = por %p626_p13, %p625_p12 }
  0x1f   :  { %p628_p1 = pnand %p627_p0, %p621_p11 }
  0x21   :  { %631 = shalt.err (!%p628_p1)
}
  0x22   :  { %28 = dma.hbm_to_vmem [thread:$0]  %s837_s1, 1024, %s730_s27, [#allocation3], %s684_s13, %s684_s13, %s685_s14  }
  0x23   :  { %s686_s26 = smov [#allocation7]   ;;  %s632_s8 = scalar_lea.hbm %s841_s5, 1024 }
  0x24   :  { %s50_s28 = sshll.u32 %s686_s26, 4  ;;  %p633_p2 = scmp.ne.s32.totalorder %s841_s5, %s632_s8  ;;  %s51_s28 = int_to_ptr.vmem [resolvable:$true] %s50_s28 }
  0x25   :  { %p636_p3 = scmp.lt.u32.totalorder %s632_s8, %s841_s5 }
  0x27   :  { %p638_p4 = pnand %p636_p3, %p633_p2 }
  0x29   :  { %641 = shalt.err (!%p638_p4)
}
  0x2a   :  { %s642_s15 = scalar_lea.vmem %s51_s28, 1024  ;;  %p647_p6 = scmp.lt.s32.totalorder %s51_s28, %s51_s28 }
  0x2b   :  { %p643_p5 = scmp.ne.s32.totalorder %s51_s28, %s642_s15  ;;  %p648_p7 = scmp.lt.s32.totalorder %s642_s15, %s642_s15 }
  0x2d   :  { %p649_p8 = por %p648_p7, %p647_p6 }
  0x2f   :  { %p650_p9 = pnand %p649_p8, %p643_p5 }
  0x31   :  { %653 = shalt.err (!%p650_p9)
}
  0x32   :  { %56 = dma.hbm_to_vmem [thread:$0]  %s841_s5, 1024, %s51_s28, [#allocation6], %s684_s13, %s684_s13, %s685_s14  }
  0x33   :  { %676 = dma.done.wait [#allocation3], 1024  }
  0x34   :  { %677 = vsyncadd [#allocation3], 4294966272 }
  0x35   :  { %678 = dma.done.wait [#allocation6], 2048  }
  0x36   :  { %679 = vsyncadd [#allocation6], 4294965248  ;;  %v687_v0 = vmov 0.0   ;;  %vm688_vm0 = vmmov 0   ;;  %v560_v1 = vld [vmem:[#allocation2] sm:$0xff]   ;;  %v561_v2 = vld [vmem:[#allocation2 + $0x8] sm:$0xff]   ;;  %v408_v43 = vlaneseq }
  0x37   :  { %492 = vmatprep.subr.bf16.mxu0 %v687_v0  ;;  %508 = vmatprep.mubr.msk.bf16.mxu0 %vm688_vm0, %v687_v0  ;;  %v562_v3 = vld [vmem:[#allocation2 + $0x10] sm:$0xff]   ;;  %v568_v4 = vld [vmem:[#allocation5] sm:$0xff]   ;;  %v563_v5 = vld [vmem:[#allocation2 + $0x18] sm:$0xff]  }
  0x38   :  { %512 = vmatprep.subr.bf16.mxu1 %v687_v0  ;;  %528 = vmatprep.mubr.msk.bf16.mxu1 %vm688_vm0, %v687_v0  ;;  %v569_v6 = vld [vmem:[#allocation5 + $0x8] sm:$0xff]   ;;  %v564_v7 = vld [vmem:[#allocation2 + $0x20] sm:$0xff]   ;;  %v570_v8 = vld [vmem:[#allocation5 + $0x10] sm:$0xff]   ;;  %v409_v44 = vand.u32 127, %v408_v43 }
  0x39   :  { %493 = vmatpush3.bf16.msra.mxu0 %v560_v1  ;;  %513 = vmatpush3.bf16.msra.mxu1 %v568_v4  ;;  %v565_v9 = vld [vmem:[#allocation2 + $0x28] sm:$0xff]   ;;  %v571_v10 = vld [vmem:[#allocation5 + $0x18] sm:$0xff]   ;;  %v566_v11 = vld [vmem:[#allocation2 + $0x30] sm:$0xff]  }
  0x3a   :  { %494 = vmatprep.subr.bf16.mxu0 %v687_v0  ;;  %514 = vmatprep.subr.bf16.mxu1 %v687_v0  ;;  %v572_v12 = vld [vmem:[#allocation5 + $0x20] sm:$0xff]   ;;  %v567_v13 = vld [vmem:[#allocation2 + $0x38] sm:$0xff]   ;;  %v573_v15 = vld [vmem:[#allocation5 + $0x28] sm:$0xff]   ;;  %vm410_vm1 = vcmp.lt.s32.totalorder %v409_v44, 8 }
  0x3b   :  { %v69_v14 = vld [vmem:[%s836_s0] sm:$0xff]  ;;  %v574_v17 = vld [vmem:[#allocation5 + $0x30] sm:$0xff]   ;;  %v575_v18 = vld [vmem:[#allocation5 + $0x38] sm:$0xff]  }
  0x3c   :  { %v70_v16 = vpack.c.bf16 %v69_v14, %v69_v14  ;;  %v576_v19 = vld [vmem:[#allocation7] sm:$0xff]   ;;  %v577_v20 = vld [vmem:[#allocation7 + $0x8] sm:$0xff]   ;;  %v578_v21 = vld [vmem:[#allocation7 + $0x10] sm:$0xff]  }
  0x3d   :  { %495 = vmatpush3.bf16.msra.mxu0 %v561_v2  ;;  %515 = vmatpush3.bf16.msra.mxu1 %v569_v6  ;;  %v579_v22 = vld [vmem:[#allocation7 + $0x18] sm:$0xff]   ;;  %v580_v23 = vld [vmem:[#allocation7 + $0x20] sm:$0xff]   ;;  %v581_v24 = vld [vmem:[#allocation7 + $0x28] sm:$0xff]  }
  0x3e   :  { %496 = vmatprep.subr.bf16.mxu0 %v687_v0  ;;  %516 = vmatprep.subr.bf16.mxu1 %v687_v0  ;;  %v438_v25 = vld [vmem:[%s838_s2] ss:$0 sm:$0xff]  ;;  %v582_v33 = vld [vmem:[#allocation7 + $0x30] sm:$0xff]   ;;  %v583_v34 = vld [vmem:[#allocation7 + $0x38] sm:$0xff]  }
  0x3f   :  { %v447_v35 = vld [vmem:[%s840_s4] ss:$0 sm:$0xff]  ;;  %s689_s4 = smov [#allocation8]  }
  0x40   :  { %v456_v45 = vld [vmem:[%s842_s6] ss:$0 sm:$0xff]  ;;  %s428_s19 = sshll.u32 %s689_s4, 4  ;;  %s429_s19 = int_to_ptr.vmem [resolvable:$true] %s428_s19 }
  0x41   :  { %497 = vmatpush3.bf16.msra.mxu0 %v562_v3  ;;  %517 = vmatpush3.bf16.msra.mxu1 %v570_v8  ;;  %s654_s6 = scalar_lea.vmem %s429_s19, 128  ;;  %p659_p11 = scmp.lt.s32.totalorder %s429_s19, %s429_s19 }
  0x42   :  { %498 = vmatprep.subr.bf16.mxu0 %v687_v0  ;;  %518 = vmatprep.subr.bf16.mxu1 %v687_v0  ;;  %p655_p10 = scmp.ne.s32.totalorder %s429_s19, %s654_s6  ;;  %p660_p12 = scmp.lt.s32.totalorder %s654_s6, %s654_s6 }
  0x44   :  { %p661_p13 = por %p660_p12, %p659_p11 }
  0x45   :  { %499 = vmatpush3.bf16.msra.mxu0 %v563_v5  ;;  %519 = vmatpush3.bf16.msra.mxu1 %v571_v10 }
  0x46   :  { %500 = vmatprep.subr.bf16.mxu0 %v687_v0  ;;  %520 = vmatprep.subr.bf16.mxu1 %v687_v0  ;;  %p662_p0 = pnand %p661_p13, %p655_p10 }
  0x49   :  { %501 = vmatpush3.bf16.msra.mxu0 %v564_v7  ;;  %521 = vmatpush3.bf16.msra.mxu1 %v572_v12 }
  0x4a   :  { %502 = vmatprep.subr.bf16.mxu0 %v687_v0  ;;  %522 = vmatprep.subr.bf16.mxu1 %v687_v0 }
  0x4d   :  { %503 = vmatpush3.bf16.msra.mxu0 %v565_v9  ;;  %523 = vmatpush3.bf16.msra.mxu1 %v573_v15 }
  0x4e   :  { %504 = vmatprep.subr.bf16.mxu0 %v687_v0  ;;  %524 = vmatprep.subr.bf16.mxu1 %v687_v0 }
  0x51   :  { %505 = vmatpush3.bf16.msra.mxu0 %v566_v11  ;;  %525 = vmatpush3.bf16.msra.mxu1 %v574_v17 }
  0x52   :  { %506 = vmatprep.subr.bf16.mxu0 %v687_v0  ;;  %526 = vmatprep.subr.bf16.mxu1 %v687_v0 }
  0x55   :  { %507 = vmatpush3.bf16.msra.mxu0 %v567_v13  ;;  %527 = vmatpush3.bf16.msra.mxu1 %v575_v18 }
  0x56   :  { %532 = vmatprep.subr.bf16.mxu0 %v687_v0 }
  0x58   :  { %509 = vmatmul.mubr.bf16.vlgmr.msra.gmra.mrb[0].mxu0 %v70_v16 }
  0x59   :  { %548 = vmatprep.mubr.msk.bf16.mxu0 %vm688_vm0, %v687_v0  ;;  %533 = vmatpush3.bf16.msra.mxu0 %v576_v19 }
  0x5a   :  { %534 = vmatprep.subr.bf16.mxu0 %v687_v0 }
  0x5d   :  { %535 = vmatpush3.bf16.msra.mxu0 %v577_v20 }
  0x5e   :  { %536 = vmatprep.subr.bf16.mxu0 %v687_v0 }
  0x61   :  { %537 = vmatpush3.bf16.msra.mxu0 %v578_v21 }
  0x62   :  { %538 = vmatprep.subr.bf16.mxu0 %v687_v0 }
  0x65   :  { %539 = vmatpush3.bf16.msra.mxu0 %v579_v22 }
  0x66   :  { %540 = vmatprep.subr.bf16.mxu0 %v687_v0 }
  0x69   :  { %541 = vmatpush3.bf16.msra.mxu0 %v580_v23 }
  0x6a   :  { %542 = vmatprep.subr.bf16.mxu0 %v687_v0 }
  0x6d   :  { %543 = vmatpush3.bf16.msra.mxu0 %v581_v24 }
  0x6e   :  { %544 = vmatprep.subr.bf16.mxu0 %v687_v0 }
  0x71   :  { %545 = vmatpush3.bf16.msra.mxu0 %v582_v33 }
  0x72   :  { %546 = vmatprep.subr.bf16.mxu0 %v687_v0 }
  0x75   :  { %547 = vmatpush3.bf16.msra.mxu0 %v583_v34 }
 0x12b   :  { %v176_v26 = vpop.f32.mrb[0].mxu0 }
 0x12c   :  { %v177_v27 = vadd.f32 %v438_v25, %v176_v26  ;;  %v510_v28 = vpop.f32.mrb[1].mxu0 }
 0x12d   :  { %v179_v29 = vpop.f32.mrb[2].mxu0 }
 0x12e   :  { %v182_v30 = vmax.f32 %v177_v27, 0.0  ;;  %v511_v31 = vpop.f32.mrb[3].mxu0 }
 0x130   :  { %v183_v32 = vpack.c.bf16 %v182_v30, %v182_v30 }
 0x132   :  { %529 = vmatmul.mubr.bf16.vlgmr.msra.gmra.mrb[0].mxu1 %v183_v32 }
 0x205   :  { %v289_v36 = vpop.f32.mrb[0].mxu1 }
 0x206   :  { %v290_v37 = vadd.f32 %v447_v35, %v289_v36  ;;  %v530_v38 = vpop.f32.mrb[1].mxu1 }
 0x207   :  { %v292_v39 = vpop.f32.mrb[2].mxu1 }
 0x208   :  { %v295_v40 = vmax.f32 %v290_v37, 0.0  ;;  %v531_v41 = vpop.f32.mrb[3].mxu1 }
 0x20a   :  { %v296_v42 = vpack.c.bf16 %v295_v40, %v295_v40 }
 0x20c   :  { %549 = vmatmul.mubr.bf16.vlgmr.msra.gmra.mrb[4].mxu0 %v296_v42 }
 0x2df   :  { %v402_v46 = vpop.f32.mrb[4].mxu0 }
 0x2e0   :  { %v403_v47 = vadd.f32 %v456_v45, %v402_v46  ;;  %v550_v48 = vpop.f32.mrb[5].mxu0 }
 0x2e1   :  { %v405_v49 = vpop.f32.mrb[6].mxu0 }
 0x2e2   :  { %v551_v50 = vpop.f32.mrb[7].mxu0  ;;  %v411_v51 = vsel %vm410_vm1, %v403_v47, -1e+30 }
 0x2e3   :  { %412 = vmax.xlane.f32.xlu0 %v411_v51 }
 0x370   :  { %v413_v52 = vpop.xlane.xlu0 %412 }
 0x371   :  { %v414_v53 = vsub.f32 %v411_v51, %v413_v52 }
 0x373   :  { %v415_v54 = vmul.f32 1.442695, %v414_v53 }
 0x375   :  { %584 = vpow2.f32 %v415_v54 }
 0x37f   :  { %v585_v55 = vpop.eup %584 }
 0x380   :  { %417 = vadd.xlane.f32.xlu0 %v585_v55 }
 0x40d   :  { %v418_v56 = vpop.xlane.xlu0 %417 }
 0x40e   :  { %586 = vrcp.f32 %v418_v56 }
 0x418   :  { %v587_v57 = vpop.eup %586 }
 0x419   :  { %v420_v58 = vmul.f32 %v587_v57, %v585_v55 }
 0x41b   :  { %421 = vst [vmem:[#allocation8] sm:$0xff] %v420_v58 }
 0x41c   :  { %665 = shalt.err (!%p662_p0)
}
 0x41d   :  { %s666_s22 = scalar_lea.hbm %s843_s7, 128 }
 0x41e   :  { %p667_p1 = scmp.ne.s32.totalorder %s843_s7, %s666_s22  ;;  %p670_p2 = scmp.lt.u32.totalorder %s666_s22, %s843_s7 }
 0x420   :  { %p672_p3 = pnand %p670_p2, %p667_p1 }
 0x422   :  { %675 = shalt.err (!%p672_p3)
}
 0x423   :  { %431 = dma.vmem_to_hbm [thread:$0]  %s429_s19, 128, %s843_s7, [#allocation4]  }
 0x424   :  { %680 = dma.done.wait [#allocation4], 128  }
 0x425   :  { %681 = vsyncadd [#allocation4], 4294967168 }
 0x426   :  { %435 = vsyncpa [#allocation3], 1 }
 0x427   :  { %436 = vsyncpa [#allocation6], 1 }
 0x428   :  { %437 = vsyncpa [#allocation4], 1 }

</bundles_post_ra>
